<compile_context>
chip_gen: v6e
topology: v6e:2x2x1
jax: 0.10.0
libtpu: 0.0.40
codegen_flags: <defaults>
</compile_context>

<pallas_src>
import functools

import jax
import jax.numpy as jnp
from jax.experimental import pallas as pl
from jax.experimental.pallas import tpu as pltpu


def _round_up(x: int, m: int) -> int:
    return ((x + m - 1) // m) * m


def dqn_mlp_kernel(x_ref, w1_ref, b1_ref, w2_ref, b2_ref, o_ref):
    """relu(x @ w1 + b1) @ w2 + b2 for one batch tile (fully fused)."""
    # Hidden layer: bf16 MXU matmul with f32 accumulation; bias + ReLU in f32.
    h = jnp.dot(x_ref[...], w1_ref[...], preferred_element_type=jnp.float32)
    h = jnp.maximum(h + b1_ref[...], 0.0)
    # Output layer: cast back to the matmul dtype for the MXU, accumulate in f32.
    q = jnp.dot(h.astype(w2_ref.dtype), w2_ref[...],
                preferred_element_type=jnp.float32) + b2_ref[...]
    # Store only the real action columns (output array is (B_pad, num_actions)),
    # not the 128-lane padded slab.
    a = o_ref.shape[-1]
    o_ref[...] = q[:, :a].astype(o_ref.dtype)


@functools.partial(jax.jit, static_argnames=("max_block_b", "use_bf16"))
def dqn_forward(x, w1, b1, w2, b2, *, max_block_b=2048, use_bf16=True):
    """Q = relu(x @ w1 + b1) @ w2 + b2, weights stored as (in, out)."""
    B, K = x.shape
    H = w1.shape[1]
    A = w2.shape[1]
    LANE = 128

    # --- Batch tiling: one grid step for typical replay batches ----------------
    if B <= max_block_b:
        grid_b = 1
        tb = _round_up(B, 8)
    else:
        grid_b = pl.cdiv(B, max_block_b)
        tb = _round_up(pl.cdiv(B, grid_b), 8)  # even split across tiles / TCs
    B_pad = tb * grid_b

    # --- Dtypes: bf16 operands for the MXU, f32 accumulate / epilogue ----------
    dot_dt = jnp.bfloat16 if use_bf16 else jnp.float32
    x_c = x.astype(dot_dt)
    w1_c = w1.astype(dot_dt)
    w2_c = w2.astype(dot_dt)

    # Lane-pad second-layer weights/bias to 128 (tiny, ~32 KiB) so the second
    # matmul stays on the standard >=128-lane MXU path; the kernel slices the
    # real action columns before storing.
    A_pad = _round_up(A, LANE)
    if A_pad != A:
        w2_c = jnp.pad(w2_c, ((0, 0), (0, A_pad - A)))
        b2_p = jnp.pad(b2, ((0, 0), (0, A_pad - A)))
    else:
        b2_p = b2

    # Pad the batch only when needed (never for power-of-two batches <= cap).
    x_p = x_c if B_pad == B else jnp.pad(x_c, ((0, B_pad - B), (0, 0)))

    item = jnp.dtype(dot_dt).itemsize
    cost = pl.CostEstimate(
        flops=2 * B_pad * (K * H + H * A_pad),
        transcendentals=0,
        bytes_accessed=(x_p.size + w1_c.size + w2_c.size) * item
        + (b1.size + b2_p.size + B_pad * A) * 4,
    )

    out = pl.pallas_call(
        dqn_mlp_kernel,
        out_shape=jax.ShapeDtypeStruct((B_pad, A), jnp.float32),
        grid_spec=pl.GridSpec(
            grid=(grid_b,),
            in_specs=[
                # x: streamed over batch tiles (single tile for B <= max_block_b).
                pl.BlockSpec((tb, K), lambda i: (i, 0)),
                # Weights / biases: constant index_maps -> DMA'd once, VMEM-resident.
                pl.BlockSpec((K, H), lambda i: (0, 0)),
                pl.BlockSpec((1, H), lambda i: (0, 0)),
                pl.BlockSpec((H, A_pad), lambda i: (0, 0)),
                pl.BlockSpec((1, A_pad), lambda i: (0, 0)),
            ],
            out_specs=pl.BlockSpec((tb, A), lambda i: (i, 0)),
        ),
        compiler_params=pltpu.CompilerParams(
            # Split batch tiles across v7x TensorCores only when there are >= 2
            # tiles of real work; single-tile grids stay on one core.
            dimension_semantics=("parallel",) if grid_b > 1 else ("arbitrary",)),
        cost_estimate=cost,
    )(x_p, w1_c, b1, w2_c, b2_p)

    # Row slice only if batch padding was added.
    return out if B_pad == B else out[:B]


def init_dqn_params(key, num_inputs, num_actions, hidden_sizes=(128,)):
    """nn.Linear-style init (uniform +/- 1/sqrt(fan_in)), stored as (in, out)."""
    params = []
    in_size = num_inputs
    sizes = list(hidden_sizes) + [num_actions]
    for size in sizes:
        key, kw, kb = jax.random.split(key, 3)
        bound = 1.0 / jnp.sqrt(jnp.float32(in_size))
        w = jax.random.uniform(kw, (in_size, size), jnp.float32, -bound, bound)
        b = jax.random.uniform(kb, (1, size), jnp.float32, -bound, bound)
        params.append((w, b))
        in_size = size
    return params


def _ref_forward(x, w1, b1, w2, b2, dot_dt=jnp.bfloat16):
    """Pure-JAX reference using the same bf16-operand / f32-accumulate recipe."""
    h = jnp.dot(x.astype(dot_dt), w1.astype(dot_dt),
                preferred_element_type=jnp.float32) + b1
    h = jnp.maximum(h, 0.0)
    return jnp.dot(h.astype(dot_dt), w2.astype(dot_dt),
                   preferred_element_type=jnp.float32) + b2


if __name__ == "__main__":
    NUM_INPUTS = 16   # num_inputs
    HIDDEN = 128      # hidden_sizes=[128]
    NUM_ACTIONS = 4   # num_actions

    key = jax.random.PRNGKey(0)
    key, kx = jax.random.split(key)
    (w1, b1), (w2, b2) = init_dqn_params(key, NUM_INPUTS, NUM_ACTIONS, (HIDDEN,))

    # Small shape (module defaults): single grid step, rows padded 2 -> 8.
    x_small = jax.random.normal(kx, (2, NUM_INPUTS), jnp.float32)
    q_small = dqn_forward(x_small, w1, b1, w2, b2)
    jax.block_until_ready(q_small)
    assert q_small.shape == (2, NUM_ACTIONS)
    assert jnp.allclose(q_small, _ref_forward(x_small, w1, b1, w2, b2),
                        atol=5e-3, rtol=5e-3)

    # Replay-buffer batch: B=1000 -> one 1008-row tile (single grid step).
    key, kx2 = jax.random.split(key)
    x_mid = jax.random.normal(kx2, (1000, NUM_INPUTS), jnp.float32)
    q_mid = dqn_forward(x_mid, w1, b1, w2, b2)
    jax.block_until_ready(q_mid)
    assert q_mid.shape == (1000, NUM_ACTIONS)
    assert jnp.allclose(q_mid, _ref_forward(x_mid, w1, b1, w2, b2),
                        atol=5e-3, rtol=5e-3)

    # Large batch: B=4096 -> two 2048-row tiles, "parallel" (v7x 2-TC split path).
    key, kx3 = jax.random.split(key)
    x_big = jax.random.normal(kx3, (4096, NUM_INPUTS), jnp.float32)
    q_big = dqn_forward(x_big, w1, b1, w2, b2)
    jax.block_until_ready(q_big)
    assert q_big.shape == (4096, NUM_ACTIONS)
    assert jnp.allclose(q_big, _ref_forward(x_big, w1, b1, w2, b2),
                        atol=5e-3, rtol=5e-3)

    print("KERNEL_OK")
</pallas_src>

<mosaic_0001>
module attributes {stable_mosaic.version = 11 : i64} {
  func.func @dqn_mlp_kernel(%arg0: i32, %arg1: memref<8x16xbf16, #tpu.memory_space<vmem>>, %arg2: memref<16x128xbf16, #tpu.memory_space<vmem>>, %arg3: memref<1x128xf32, #tpu.memory_space<vmem>>, %arg4: memref<128x128xbf16, #tpu.memory_space<vmem>>, %arg5: memref<1x128xf32, #tpu.memory_space<vmem>>, %arg6: memref<8x4xf32, #tpu.memory_space<vmem>>) attributes {dimension_semantics = [#tpu.dimension_semantics<arbitrary>], iteration_bounds = array<i64: 1>, scalar_prefetch = 0 : i64, scratch_operands = 0 : i64, tpu.core_type = #tpu.core_type<tc>, window_params = [{transform_indices = @transform_0, window_bounds = array<i64: 8, 16>}, {pipeline_mode = #tpu.pipeline_mode<synchronous>, transform_indices = @transform_1, window_bounds = array<i64: 16, 128>}, {pipeline_mode = #tpu.pipeline_mode<synchronous>, transform_indices = @transform_2, window_bounds = array<i64: 1, 128>}, {pipeline_mode = #tpu.pipeline_mode<synchronous>, transform_indices = @transform_3, window_bounds = array<i64: 128, 128>}, {pipeline_mode = #tpu.pipeline_mode<synchronous>, transform_indices = @transform_4, window_bounds = array<i64: 1, 128>}, {transform_indices = @transform_5, window_bounds = array<i64: 8, 4>}]} {
    %c0 = arith.constant 0 : index
    %c0_0 = arith.constant 0 : index
    %0 = vector.load %arg1[%c0, %c0_0] : memref<8x16xbf16, #tpu.memory_space<vmem>>, vector<8x16xbf16>
    %c0_1 = arith.constant 0 : index
    %c0_2 = arith.constant 0 : index
    %1 = vector.load %arg2[%c0_1, %c0_2] : memref<16x128xbf16, #tpu.memory_space<vmem>>, vector<16x128xbf16>
    %cst = arith.constant dense<0.000000e+00> : vector<8x128xf32>
    %2 = tpu.matmul %0, %1, %cst {dimension_numbers = #tpu.dot_dimension_numbers<[1], [0], [0], [1], [0, 0, 1, 1], [], []>} : vector<8x16xbf16>, vector<16x128xbf16>, vector<8x128xf32> -> vector<8x128xf32>
    %c0_3 = arith.constant 0 : index
    %c0_4 = arith.constant 0 : index
    %3 = vector.load %arg3[%c0_3, %c0_4] : memref<1x128xf32, #tpu.memory_space<vmem>>, vector<1x128xf32>
    %4 = vector.broadcast %3 : vector<1x128xf32> to vector<8x128xf32>
    %5 = arith.addf %2, %4 : vector<8x128xf32>
    %cst_5 = arith.constant 0.000000e+00 : f32
    %6 = vector.broadcast %cst_5 : f32 to vector<8x128xf32>
    %7 = arith.maximumf %5, %6 : vector<8x128xf32>
    %8 = arith.truncf %7 : vector<8x128xf32> to vector<8x128xbf16>
    %c0_6 = arith.constant 0 : index
    %c0_7 = arith.constant 0 : index
    %9 = vector.load %arg4[%c0_6, %c0_7] : memref<128x128xbf16, #tpu.memory_space<vmem>>, vector<128x128xbf16>
    %cst_8 = arith.constant dense<0.000000e+00> : vector<8x128xf32>
    %10 = tpu.matmul %8, %9, %cst_8 {dimension_numbers = #tpu.dot_dimension_numbers<[1], [0], [0], [1], [0, 0, 1, 1], [], []>} : vector<8x128xbf16>, vector<128x128xbf16>, vector<8x128xf32> -> vector<8x128xf32>
    %c0_9 = arith.constant 0 : index
    %c0_10 = arith.constant 0 : index
    %11 = vector.load %arg5[%c0_9, %c0_10] : memref<1x128xf32, #tpu.memory_space<vmem>>, vector<1x128xf32>
    %12 = vector.broadcast %11 : vector<1x128xf32> to vector<8x128xf32>
    %13 = arith.addf %10, %12 : vector<8x128xf32>
    %14 = vector.extract_strided_slice %13 {offsets = [0, 0], sizes = [8, 4], strides = [1, 1]} : vector<8x128xf32> to vector<8x4xf32>
    %c0_11 = arith.constant 0 : index
    %c0_12 = arith.constant 0 : index
    %15 = vector.load %arg6[%c0_11, %c0_12] : memref<8x4xf32, #tpu.memory_space<vmem>>, vector<8x4xf32>
    tpu.vector_store %arg6[%c0_11, %c0_12], %14 {strides = array<i32>} : memref<8x4xf32, #tpu.memory_space<vmem>>, vector<8x4xf32>,
    return
  }
  func.func @transform_0(%arg0: i32) -> (i32, i32) {
    %c0_i32 = arith.constant 0 : i32
    %c0_i32_0 = arith.constant 0 : i32
    return %arg0, %c0_i32 : i32, i32
  }
  func.func @transform_1(%arg0: i32) -> (i32, i32) {
    %c0_i32 = arith.constant 0 : i32
    %c0_i32_0 = arith.constant 0 : i32
    %c0_i32_1 = arith.constant 0 : i32
    return %c0_i32, %c0_i32_0 : i32, i32
  }
  func.func @transform_2(%arg0: i32) -> (i32, i32) {
    %c0_i32 = arith.constant 0 : i32
    %c0_i32_0 = arith.constant 0 : i32
    %c0_i32_1 = arith.constant 0 : i32
    return %c0_i32, %c0_i32_0 : i32, i32
  }
  func.func @transform_3(%arg0: i32) -> (i32, i32) {
    %c0_i32 = arith.constant 0 : i32
    %c0_i32_0 = arith.constant 0 : i32
    %c0_i32_1 = arith.constant 0 : i32
    return %c0_i32, %c0_i32_0 : i32, i32
  }
  func.func @transform_4(%arg0: i32) -> (i32, i32) {
    %c0_i32 = arith.constant 0 : i32
    %c0_i32_0 = arith.constant 0 : i32
    %c0_i32_1 = arith.constant 0 : i32
    return %c0_i32, %c0_i32_0 : i32, i32
  }
  func.func @transform_5(%arg0: i32) -> (i32, i32) {
    %c0_i32 = arith.constant 0 : i32
    %c0_i32_0 = arith.constant 0 : i32
    return %arg0, %c0_i32 : i32, i32
  }
}

</mosaic_0001>

<bundles_post_ra>
// kernel: dqn_forward.1
= control target key start
LH: loop header
LB: loop body
LE: loop exit
PB: predicated region body
PF: predicated region fallthrough
CT: control target
= control target key end

     0   :  { %v260_v0 = vmov 0.0   ;;  %vm261_vm0 = vmmov 0   ;;  %vm37_vm1 = vcmask 130048   ;;  %vm194_vm2 = vcmask 31744   ;;  %s331_s1 = inlined_call_operand.vmem [shape: bf16[16,128], index: 1, kind: input, shape index: {}]   ;;  %s332_s0 = inlined_call_operand.vmem [shape: bf16[8,16], index: 0, kind: input, shape index: {}]   ;;  %s333_s3 = inlined_call_operand.vmem [shape: bf16[128,128], index: 3, kind: input, shape index: {}]   ;;  %s334_s2 = inlined_call_operand.vmem [shape: f32[1,128], index: 2, kind: input, shape index: {}]   ;;  %s335_s4 = inlined_call_operand.vmem [shape: f32[1,128], index: 4, kind: input, shape index: {}]   ;;  %s336_s5 = inlined_call_operand.vmem [shape: f32[8,4], index: 5, kind: output, shape index: {}]  }
   0x1   :  { %223 = vmatprep.subr.bf16.mxu0 %v260_v0  ;;  %v251_v1 = vld [vmem:[%s331_s1] sm:$0xff]   ;;  %225 = vmatprep.mubr.msk.bf16.mxu0 %vm261_vm0, %v260_v0  ;;  %v252_v3 = vld [vmem:[%s333_s3 + $0x38] sm:$0xff]   ;;  %v253_v4 = vld [vmem:[%s333_s3 + $0x30] sm:$0xff]  }
   0x2   :  { %v21_v2 = vld [vmem:[%s332_s0] sm:$0xf]  ;;  %229 = vmatprep.subr.bf16.mxu1 %v260_v0  ;;  %245 = vmatprep.mubr.msk.bf16.mxu1 %vm261_vm0, %v260_v0  ;;  %v254_v5 = vld [vmem:[%s333_s3 + $0x28] sm:$0xff]   ;;  %v256_v7 = vld [vmem:[%s333_s3 + $0x18] sm:$0xff]  }
   0x3   :  { %224 = vmatpush3.bf16.msra.mxu0 %v251_v1  ;;  %230 = vmatpush3.bf16.msra.mxu1 %v252_v3  ;;  %v255_v6 = vld [vmem:[%s333_s3 + $0x20] sm:$0xff]   ;;  %v257_v8 = vld [vmem:[%s333_s3 + $0x10] sm:$0xff]   ;;  %v258_v9 = vld [vmem:[%s333_s3 + $0x8] sm:$0xff]  }
   0x4   :  { %231 = vmatprep.subr.bf16.mxu1 %v260_v0  ;;  %v259_v10 = vld [vmem:[%s333_s3] sm:$0xff]  }
   0x5   :  { %v200_v11 = vld [vmem:[%s334_s2] ss:$0 sm:$0xff] }
   0x6   :  { %226 = vmatmul.mubr.msk.bf16.vlgmr.msra.gmra.mxu0 %vm37_vm1, %v21_v2  ;;  %v203_v19 = vld [vmem:[%s335_s4] ss:$0 sm:$0xff] }
   0x7   :  { %232 = vmatpush3.bf16.msra.mxu1 %v253_v4 }
   0x8   :  { %233 = vmatprep.subr.bf16.mxu1 %v260_v0 }
   0xb   :  { %234 = vmatpush3.bf16.msra.mxu1 %v254_v5 }
   0xc   :  { %235 = vmatprep.subr.bf16.mxu1 %v260_v0 }
   0xf   :  { %236 = vmatpush3.bf16.msra.mxu1 %v255_v6 }
  0x10   :  { %237 = vmatprep.subr.bf16.mxu1 %v260_v0 }
  0x13   :  { %238 = vmatpush3.bf16.msra.mxu1 %v256_v7 }
  0x14   :  { %239 = vmatprep.subr.bf16.mxu1 %v260_v0 }
  0x17   :  { %240 = vmatpush3.bf16.msra.mxu1 %v257_v8 }
  0x18   :  { %241 = vmatprep.subr.bf16.mxu1 %v260_v0 }
  0x1b   :  { %242 = vmatpush3.bf16.msra.mxu1 %v258_v9 }
  0x1c   :  { %243 = vmatprep.subr.bf16.mxu1 %v260_v0 }
  0x1f   :  { %244 = vmatpush3.bf16.msra.mxu1 %v259_v10 }
  0xc6   :  { %v75_v12 = vpop.f32.mrf.mxu0 }
  0xc7   :  { %v76_v13 = vadd.f32 %v200_v11, %v75_v12 }
  0xc8   :  { %v227_v14 = vpop.f32.mrf.mxu0 }
  0xc9   :  { %v81_v15 = vmax.f32 %v76_v13, 0.0 }
  0xca   :  { %v78_v16 = vpop.f32.mrf.mxu0 }
  0xcb   :  { %v82_v17 = vpack.c.bf16 %v81_v15, %v81_v15 }
  0xcc   :  { %v228_v18 = vpop.f32.mrf.mxu0 }
  0xcd   :  { %246 = vmatmul.mubr.bf16.vlgmr.msra.gmra.mxu1 %v82_v17 }
 0x18d   :  { %v188_v20 = vpop.f32.mrf.mxu1 }
 0x18e   :  { %v189_v21 = vadd.f32 %v203_v19, %v188_v20 }
 0x18f   :  { %v247_v22 = vpop.f32.mrf.mxu1 }
 0x190   :  { %195 = vst.msk [vmem:[%s336_s5] sm:$0xff] %vm194_vm2, %v189_v21 }
 0x191   :  { %v191_v23 = vpop.f32.mrf.mxu1 }
 0x193   :  { %v248_v24 = vpop.f32.mrf.mxu1 }

</bundles_post_ra>
